<compile_context>
chip_gen: v7x
topology: tpu7x:2x2x1
jax: 0.10.0
libtpu: 0.0.40
codegen_flags: <defaults>
</compile_context>

<pallas_src>
import functools

import jax
import jax.numpy as jnp
import numpy as np
from jax.experimental import pallas as pl
from jax.experimental.pallas import tpu as pltpu

BN_EPS = 1e-5


def _round_up(x, m):
    return (x + m - 1) // m * m


def _pair(v):
    return (v, v) if isinstance(v, int) else tuple(v)


def _pick_row_tile(ohw):
    """Spatial rows per M tile (per image)."""
    if ohw < 128:
        # Small feature maps: one tile per image, multiple of 16 (bf16 sublane pack).
        return max(_round_up(ohw, 16), 16)
    for cand in (512, 256):
        if _round_up(ohw, cand) - ohw <= ohw // 4:
            return cand
    return 128


def _pick_div_tile(total, candidates):
    """Largest candidate that divides `total`; falls back to `total` itself."""
    for cand in candidates:
        if cand <= total and total % cand == 0:
            return cand
    return total


# ---------------------------------------------------------------------------
# Pass A: conv-as-matmul + partial BN statistics
# ---------------------------------------------------------------------------
def _conv_stats_kernel(p_ref, w_ref, conv_ref, stats_ref, acc_ref):
    """One (M-tile, OC-tile) output block, accumulated over the K grid axis.

    p_ref    [TM, TK] bf16   im2col patches tile
    w_ref    [TK, TN] bf16   weight tile
    conv_ref [TM, TN] bf16   conv intermediate (written at last K step)
    stats_ref[ 8, TN] f32    row 0 = per-channel sum, row 1 = sum of squares
    acc_ref  [TM, TN] f32    VMEM accumulator (f32 K-accumulation while the
                             HBM intermediate stays bf16)
    """
    k = pl.program_id(2)

    @pl.when(k == 0)
    def _():
        acc_ref[...] = jnp.zeros_like(acc_ref)

    acc_ref[...] += jnp.dot(p_ref[...], w_ref[...],
                            preferred_element_type=jnp.float32)

    @pl.when(k == pl.num_programs(2) - 1)
    def _():
        acc = acc_ref[...]                                   # [TM, TN] f32
        conv_ref[...] = acc.astype(conv_ref.dtype)
        # Static-slice stores (perf review): no iota + nested select on the
        # epilogue.  Rows 2..7 of the stats block are never read.
        stats_ref[0:1, :] = jnp.sum(acc, axis=0, keepdims=True)
        stats_ref[1:2, :] = jnp.sum(acc * acc, axis=0, keepdims=True)


# ---------------------------------------------------------------------------
# Pass B: per-channel affine (folded BN) + ReLU + in-kernel NHWC->NCHW
# ---------------------------------------------------------------------------
def _bn_relu_transpose_kernel(conv_ref, scale_ref, bias_ref, o_ref):
    """conv_ref [1, TB, TN] bf16, scale/bias [1, TN] f32, o_ref [1, TN, TB] f32.

    Affine + ReLU on the VPU; the tile transpose runs on the XLU (idle in this
    mem-bound pass) so the channels-first output layout costs no extra HBM pass.
    """
    y = conv_ref[0].astype(jnp.float32) * scale_ref[...] + bias_ref[...]
    y = jnp.maximum(y, 0.0)
    o_ref[0] = y.T


def _im2col(x, kernel_size, stride, padding, dilation):
    """x: [N, C, H, W] -> patches [N, OH*OW, C*KH*KW] (channel-major within K)."""
    n, c, h, w = x.shape
    kh, kw = kernel_size
    sh, sw = stride
    ph, pw = padding
    dh, dw = dilation

    oh = (h + 2 * ph - dh * (kh - 1) - 1) // sh + 1
    ow = (w + 2 * pw - dw * (kw - 1) - 1) // sw + 1

    x_pad = jnp.pad(x, ((0, 0), (0, 0), (ph, ph), (pw, pw)))

    cols = []
    for i in range(kh):
        for j in range(kw):
            h0 = i * dh
            w0 = j * dw
            patch = x_pad[:, :, h0:h0 + (oh - 1) * sh + 1:sh,
                                w0:w0 + (ow - 1) * sw + 1:sw]   # [N, C, OH, OW]
            cols.append(patch)
    patches = jnp.stack(cols, axis=0)                   # [KH*KW, N, C, OH, OW]
    patches = jnp.transpose(patches, (1, 3, 4, 2, 0))   # [N, OH, OW, C, KH*KW]
    patches = patches.reshape(n, oh * ow, c * kh * kw)  # K index = c*KH*KW + i*KW + j
    return patches, oh, ow


@functools.partial(jax.jit,
                   static_argnames=("kernel_size", "stride", "padding", "dilation"))
def bn_conv2d(x, weight, gamma, beta, *, kernel_size, stride, padding,
              dilation=(1, 1)):
    """Forward of BN_Conv2d (bias=False, groups=1, activation=True).

    x      : [N, C, H, W]   (NCHW, same as PyTorch)
    weight : [OC, C, KH, KW]
    gamma  : [OC]   BN weight
    beta   : [OC]   BN bias
    returns: [N, OC, OH, OW]
    """
    # TODO(synk): groups > 1 and conv bias are not implemented (module defaults used).
    # TODO(synk): BatchNorm running_mean/running_var state update not emitted
    # (forward in train mode uses batch stats only; running stats don't affect output).
    kernel_size = _pair(kernel_size)
    stride = _pair(stride)
    padding = _pair(padding)
    dilation = _pair(dilation)

    n, c, _, _ = x.shape
    oc = weight.shape[0]
    kh, kw = kernel_size

    # ---- im2col (XLA side), bf16 operands ----
    # TODO(synk): biggest remaining win per perf review -- move patch extraction
    # into Pass A (tap-decomposed matmul over a padded NHWC copy of x, Element/
    # strided-window fetches) to remove the KH*KW HBM inflation of im2col.
    # Kept in XLA here so the kernels use only plain Blocked BlockSpecs.
    x_bf16 = x.astype(jnp.bfloat16)
    patches, oh, ow = _im2col(x_bf16, kernel_size, stride, padding, dilation)
    ohw = oh * ow
    k = patches.shape[-1]
    m_real = n * ohw

    w2d = weight.reshape(oc, c * kh * kw).T.astype(jnp.bfloat16)        # [K, OC]

    # ---- tiling / padding (lane-dense OC, (8,128)-aligned blocks) ----
    ocp = _round_up(oc, 128)                        # lane-dense output channels
    tn = ocp if ocp <= 512 else _pick_div_tile(ocp, (512, 256, 128))
    nt = ocp // tn

    tm = _pick_row_tile(ohw)                        # spatial rows per M tile
    ohwp = _round_up(ohw, tm)                       # per-image row padding
    mp = n * ohwp
    mt = mp // tm                                   # >= 2 whenever N >= 2 (v7x megacore)

    kp = _round_up(k, 128)
    # Hold the entire weight resident (single K step, single OC tile) when it
    # is small: its block index never changes, so it is DMA'd exactly once.
    if nt == 1 and kp <= 2048 and kp * ocp * 2 <= 2 * 1024 * 1024:
        tk = kp
    else:
        tk = _pick_div_tile(kp, (512, 256, 128))
    kt = kp // tk
    w_resident = (nt == 1 and kt == 1)

    # Zero padding: padded rows/cols perturb neither the matmul nor BN sums.
    patches_p = jnp.pad(patches, ((0, 0), (0, ohwp - ohw), (0, kp - k)))
    patches_p = patches_p.reshape(mp, kp)
    w_p = jnp.pad(w2d, ((0, kp - k), (0, ocp - oc)))
    gamma_p = jnp.pad(gamma.astype(jnp.float32), (0, ocp - oc))
    beta_p = jnp.pad(beta.astype(jnp.float32), (0, ocp - oc))

    cost = pl.CostEstimate(
        flops=2 * mp * kp * ocp,
        transcendentals=0,
        bytes_accessed=(mp * kp * 2
                        + (1 if w_resident else mt) * kp * ocp * 2
                        + mp * ocp * 2
                        + mt * 8 * ocp * 4),
    )

    # ---- Pass A: tiled matmul + partial BN stats ----
    conv, stats = pl.pallas_call(
        _conv_stats_kernel,
        out_shape=(jax.ShapeDtypeStruct((mp, ocp), jnp.bfloat16),
                   jax.ShapeDtypeStruct((mt * 8, ocp), jnp.float32)),
        grid_spec=pltpu.PrefetchScalarGridSpec(
            num_scalar_prefetch=0,
            grid=(mt, nt, kt),
            in_specs=[
                pl.BlockSpec((tm, tk), lambda i, j, kk: (i, kk)),
                pl.BlockSpec((tk, tn), lambda i, j, kk: (kk, j)),
            ],
            out_specs=[
                pl.BlockSpec((tm, tn), lambda i, j, kk: (i, j)),
                pl.BlockSpec((8, tn), lambda i, j, kk: (i, j)),
            ],
            scratch_shapes=[pltpu.VMEM((tm, tn), jnp.float32)],
        ),
        compiler_params=pltpu.CompilerParams(
            dimension_semantics=("parallel", "parallel", "arbitrary"),
            vmem_limit_bytes=48 * 1024 * 1024),   # <= ~48 MiB so v7x (64 MiB) stays safe
        cost_estimate=cost,
    )(patches_p, w_p)

    # ---- BN batch stats -> per-channel scale/bias (tiny [OC]-sized math) ----
    stats = stats.reshape(mt, 8, ocp)
    sum_c = jnp.sum(stats[:, 0, :], axis=0)          # [OCp]
    sumsq_c = jnp.sum(stats[:, 1, :], axis=0)        # [OCp]
    mean = sum_c / m_real                            # divide by REAL M (padding rows are zero)
    var = sumsq_c / m_real - mean * mean             # biased variance (PyTorch train-mode norm)
    var = jnp.maximum(var, 0.0)                      # E[x^2]-E[x]^2 can cancel below 0
    inv_std = jax.lax.rsqrt(var + BN_EPS)
    scale = (gamma_p * inv_std).reshape(1, ocp)
    bias = (beta_p - mean * gamma_p * inv_std).reshape(1, ocp)

    # ---- Pass B: affine + ReLU + in-kernel transpose to channels-first ----
    tb = _pick_div_tile(ohwp, (1024, 512, 256, 128))   # bigger blocks: mem-bound sweep
    bt = ohwp // tb
    conv3 = conv.reshape(n, ohwp, ocp)                 # free reshape (contiguous)

    # TODO(synk): conv intermediate could be aliased away (input_output_aliases)
    # if the output kept the same shape/dtype; the folded transpose changes both.
    out3 = pl.pallas_call(
        _bn_relu_transpose_kernel,
        out_shape=jax.ShapeDtypeStruct((n, ocp, ohwp), jnp.float32),
        grid_spec=pltpu.PrefetchScalarGridSpec(
            num_scalar_prefetch=0,
            grid=(n, bt, nt),
            in_specs=[
                pl.BlockSpec((1, tb, tn), lambda b, t, j: (b, t, j)),
                pl.BlockSpec((1, tn), lambda b, t, j: (0, j)),
                pl.BlockSpec((1, tn), lambda b, t, j: (0, j)),
            ],
            out_specs=pl.BlockSpec((1, tn, tb), lambda b, t, j: (b, j, t)),
        ),
        compiler_params=pltpu.CompilerParams(
            dimension_semantics=("parallel", "parallel", "parallel"),
            vmem_limit_bytes=48 * 1024 * 1024),
    )(conv3, scale, bias)

    # Output is already channels-first: just drop padding and reshape.
    out = out3[:, :oc, :ohw].reshape(n, oc, oh, ow)
    return out


def _reference(x, weight, gamma, beta, *, stride, padding, dilation):
    """Pure-JAX reference mirroring the kernel's numerics contract:
    bf16-operand conv with f32 accumulation, train-mode batch stats from the
    f32 conv, folded scale/bias applied to the bf16-rounded conv, then ReLU."""
    conv = jax.lax.conv_general_dilated(
        x.astype(jnp.bfloat16), weight.astype(jnp.bfloat16),
        window_strides=stride,
        padding=[(padding[0], padding[0]), (padding[1], padding[1])],
        rhs_dilation=dilation,
        dimension_numbers=("NCHW", "OIHW", "NCHW"),
        preferred_element_type=jnp.float32)
    mean = jnp.mean(conv, axis=(0, 2, 3))
    var = jnp.maximum(jnp.mean(conv * conv, axis=(0, 2, 3)) - mean * mean, 0.0)
    inv_std = jax.lax.rsqrt(var + BN_EPS)
    scale = (gamma * inv_std).reshape(1, -1, 1, 1)
    bias = (beta - mean * gamma * inv_std).reshape(1, -1, 1, 1)
    conv_q = conv.astype(jnp.bfloat16).astype(jnp.float32)   # kernel stores bf16 intermediate
    return jnp.maximum(conv_q * scale + bias, 0.0)


if __name__ == "__main__":
    # Small shapes consistent with BN_Conv2d(in_channels=4, out_channels=8,
    # kernel_size=3, stride=1, padding=1)
    N, C, H, W = 2, 4, 16, 16
    OC, KH, KW = 8, 3, 3
    stride = (1, 1)
    padding = (1, 1)
    dilation = (1, 1)

    key = jax.random.PRNGKey(0)
    kx, kw_ = jax.random.split(key)
    x = jax.random.normal(kx, (N, C, H, W), dtype=jnp.float32)
    weight = jax.random.normal(kw_, (OC, C, KH, KW), dtype=jnp.float32) * 0.1
    gamma = 1.0 + 0.1 * jnp.arange(OC, dtype=jnp.float32)   # BN weight (deterministic)
    beta = 0.05 * jnp.arange(OC, dtype=jnp.float32)         # BN bias   (deterministic)

    out = bn_conv2d(x, weight, gamma, beta,
                    kernel_size=(KH, KW), stride=stride,
                    padding=padding, dilation=dilation)
    out = jax.block_until_ready(out)

    ref = jax.block_until_ready(
        _reference(x, weight, gamma, beta, stride=stride,
                   padding=padding, dilation=dilation))

    # rtol covers the rare 1-ulp double-rounding disagreement of the bf16 conv
    # intermediate (accepted per perf review); baseline diffs are ~1e-5.
    np.testing.assert_allclose(np.asarray(out), np.asarray(ref),
                               atol=2e-3, rtol=1e-2)
    print("KERNEL_OK")
</pallas_src>

<mosaic_0001>
module attributes {stable_mosaic.version = 11 : i64} {
  func.func @_conv_stats_kernel(%arg0: i32, %arg1: i32, %arg2: i32, %arg3: memref<256x128xbf16, #tpu.memory_space<vmem>>, %arg4: memref<128x128xbf16, #tpu.memory_space<vmem>>, %arg5: memref<256x128xbf16, #tpu.memory_space<vmem>>, %arg6: memref<8x128xf32, #tpu.memory_space<vmem>>, %arg7: memref<256x128xf32, #tpu.memory_space<vmem>>) attributes {dimension_semantics = [#tpu.dimension_semantics<parallel>, #tpu.dimension_semantics<parallel>, #tpu.dimension_semantics<arbitrary>], iteration_bounds = array<i64: 2, 1, 1>, scalar_prefetch = 0 : i64, scratch_operands = 1 : i64, tpu.core_type = #tpu.core_type<tc>, window_params = [{transform_indices = @transform_0, window_bounds = array<i64: 256, 128>}, {transform_indices = @transform_1, window_bounds = array<i64: 128, 128>}, {transform_indices = @transform_2, window_bounds = array<i64: 256, 128>}, {transform_indices = @transform_3, window_bounds = array<i64: 8, 128>}]} {
    %c0_i32 = arith.constant 0 : i32
    %0 = arith.cmpi eq, %arg2, %c0_i32 : i32
    %1 = arith.extui %0 : i1 to i32
    %c0_i32_0 = arith.constant 0 : i32
    %2 = arith.cmpi ne, %1, %c0_i32_0 : i32
    scf.if %2 {
      %cst_10 = arith.constant 0.000000e+00 : f32
      %12 = vector.broadcast %cst_10 : f32 to vector<256x128xf32>
      %c0_11 = arith.constant 0 : index
      %c0_12 = arith.constant 0 : index
      %13 = vector.load %arg7[%c0_11, %c0_12] : memref<256x128xf32, #tpu.memory_space<vmem>>, vector<256x128xf32>
      tpu.vector_store %arg7[%c0_11, %c0_12], %12 {strides = array<i32>} : memref<256x128xf32, #tpu.memory_space<vmem>>, vector<256x128xf32>,
    } else {
    }
    %c0 = arith.constant 0 : index
    %c0_1 = arith.constant 0 : index
    %3 = vector.load %arg7[%c0, %c0_1] : memref<256x128xf32, #tpu.memory_space<vmem>>, vector<256x128xf32>
    %c0_2 = arith.constant 0 : index
    %c0_3 = arith.constant 0 : index
    %4 = vector.load %arg3[%c0_2, %c0_3] : memref<256x128xbf16, #tpu.memory_space<vmem>>, vector<256x128xbf16>
    %c0_4 = arith.constant 0 : index
    %c0_5 = arith.constant 0 : index
    %5 = vector.load %arg4[%c0_4, %c0_5] : memref<128x128xbf16, #tpu.memory_space<vmem>>, vector<128x128xbf16>
    %cst = arith.constant dense<0.000000e+00> : vector<256x128xf32>
    %6 = tpu.matmul %4, %5, %cst {dimension_numbers = #tpu.dot_dimension_numbers<[1], [0], [0], [1], [0, 0, 1, 1], [], []>} : vector<256x128xbf16>, vector<128x128xbf16>, vector<256x128xf32> -> vector<256x128xf32>
    %7 = arith.addf %3, %6 : vector<256x128xf32>
    %c0_6 = arith.constant 0 : index
    %c0_7 = arith.constant 0 : index
    %8 = vector.load %arg7[%c0_6, %c0_7] : memref<256x128xf32, #tpu.memory_space<vmem>>, vector<256x128xf32>
    tpu.vector_store %arg7[%c0_6, %c0_7], %7 {strides = array<i32>} : memref<256x128xf32, #tpu.memory_space<vmem>>, vector<256x128xf32>,
    %c0_i32_8 = arith.constant 0 : i32
    %9 = arith.cmpi eq, %arg2, %c0_i32_8 : i32
    %10 = arith.extui %9 : i1 to i32
    %c0_i32_9 = arith.constant 0 : i32
    %11 = arith.cmpi ne, %10, %c0_i32_9 : i32
    scf.if %11 {
      %c0_10 = arith.constant 0 : index
      %c0_11 = arith.constant 0 : index
      %12 = vector.load %arg7[%c0_10, %c0_11] : memref<256x128xf32, #tpu.memory_space<vmem>>, vector<256x128xf32>
      %13 = arith.truncf %12 : vector<256x128xf32> to vector<256x128xbf16>
      %c0_12 = arith.constant 0 : index
      %c0_13 = arith.constant 0 : index
      %14 = vector.load %arg5[%c0_12, %c0_13] : memref<256x128xbf16, #tpu.memory_space<vmem>>, vector<256x128xbf16>
      tpu.vector_store %arg5[%c0_12, %c0_13], %13 {strides = array<i32>} : memref<256x128xbf16, #tpu.memory_space<vmem>>, vector<256x128xbf16>,
      %cst_14 = arith.constant dense<0.000000e+00> : vector<128xf32>
      %15 = vector.multi_reduction <add>, %12, %cst_14 [0] : vector<256x128xf32> to vector<128xf32>
      %16 = vector.shape_cast %15 : vector<128xf32> to vector<1x128xf32>
      %c0_15 = arith.constant 0 : index
      %c0_16 = arith.constant 0 : index
      %17 = vector.load %arg6[%c0_15, %c0_16] : memref<8x128xf32, #tpu.memory_space<vmem>>, vector<1x128xf32>
      tpu.vector_store %arg6[%c0_15, %c0_16], %16 {strides = array<i32>} : memref<8x128xf32, #tpu.memory_space<vmem>>, vector<1x128xf32>,
      %18 = arith.mulf %12, %12 : vector<256x128xf32>
      %cst_17 = arith.constant dense<0.000000e+00> : vector<128xf32>
      %19 = vector.multi_reduction <add>, %18, %cst_17 [0] : vector<256x128xf32> to vector<128xf32>
      %20 = vector.shape_cast %19 : vector<128xf32> to vector<1x128xf32>
      %c1 = arith.constant 1 : index
      %c0_18 = arith.constant 0 : index
      %21 = vector.load %arg6[%c1, %c0_18] : memref<8x128xf32, #tpu.memory_space<vmem>>, vector<1x128xf32>
      tpu.vector_store %arg6[%c1, %c0_18], %20 {strides = array<i32>} : memref<8x128xf32, #tpu.memory_space<vmem>>, vector<1x128xf32>,
    } else {
    }
    return
  }
  func.func @transform_0(%arg0: i32, %arg1: i32, %arg2: i32) -> (i32, i32) {
    %c0_i32 = arith.constant 0 : i32
    return %arg0, %arg2 : i32, i32
  }
  func.func @transform_1(%arg0: i32, %arg1: i32, %arg2: i32) -> (i32, i32) {
    %c0_i32 = arith.constant 0 : i32
    return %arg2, %arg1 : i32, i32
  }
  func.func @transform_2(%arg0: i32, %arg1: i32, %arg2: i32) -> (i32, i32) {
    %c0_i32 = arith.constant 0 : i32
    return %arg0, %arg1 : i32, i32
  }
  func.func @transform_3(%arg0: i32, %arg1: i32, %arg2: i32) -> (i32, i32) {
    %c0_i32 = arith.constant 0 : i32
    return %arg0, %arg1 : i32, i32
  }
}

module attributes {stable_mosaic.version = 11 : i64} {
  func.func @_bn_relu_transpose_kernel(%arg0: i32, %arg1: i32, %arg2: i32, %arg3: memref<1x256x128xbf16, #tpu.memory_space<vmem>>, %arg4: memref<1x128xf32, #tpu.memory_space<vmem>>, %arg5: memref<1x128xf32, #tpu.memory_space<vmem>>, %arg6: memref<1x128x256xf32, #tpu.memory_space<vmem>>) attributes {dimension_semantics = [#tpu.dimension_semantics<parallel>, #tpu.dimension_semantics<parallel>, #tpu.dimension_semantics<parallel>], iteration_bounds = array<i64: 2, 1, 1>, scalar_prefetch = 0 : i64, scratch_operands = 0 : i64, tpu.core_type = #tpu.core_type<tc>, window_params = [{transform_indices = @transform_0, window_bounds = array<i64: 1, 256, 128>}, {transform_indices = @transform_1, window_bounds = array<i64: 1, 128>}, {transform_indices = @transform_2, window_bounds = array<i64: 1, 128>}, {transform_indices = @transform_3, window_bounds = array<i64: 1, 128, 256>}]} {
    %c0 = arith.constant 0 : index
    %c0_0 = arith.constant 0 : index
    %c0_1 = arith.constant 0 : index
    %0 = vector.load %arg3[%c0, %c0_0, %c0_1] : memref<1x256x128xbf16, #tpu.memory_space<vmem>>, vector<1x256x128xbf16>
    %1 = vector.shape_cast %0 : vector<1x256x128xbf16> to vector<256x128xbf16>
    %2 = arith.extf %1 : vector<256x128xbf16> to vector<256x128xf32>
    %c0_2 = arith.constant 0 : index
    %c0_3 = arith.constant 0 : index
    %3 = vector.load %arg4[%c0_2, %c0_3] : memref<1x128xf32, #tpu.memory_space<vmem>>, vector<1x128xf32>
    %4 = vector.broadcast %3 : vector<1x128xf32> to vector<256x128xf32>
    %5 = arith.mulf %2, %4 : vector<256x128xf32>
    %c0_4 = arith.constant 0 : index
    %c0_5 = arith.constant 0 : index
    %6 = vector.load %arg5[%c0_4, %c0_5] : memref<1x128xf32, #tpu.memory_space<vmem>>, vector<1x128xf32>
    %7 = vector.broadcast %6 : vector<1x128xf32> to vector<256x128xf32>
    %8 = arith.addf %5, %7 : vector<256x128xf32>
    %cst = arith.constant 0.000000e+00 : f32
    %9 = vector.broadcast %cst : f32 to vector<256x128xf32>
    %10 = arith.maximumf %8, %9 : vector<256x128xf32>
    %11 = tpu.transpose %10, [1, 0] : vector<256x128xf32> -> vector<128x256xf32>
    %c0_6 = arith.constant 0 : index
    %c0_7 = arith.constant 0 : index
    %c0_8 = arith.constant 0 : index
    %12 = vector.load %arg6[%c0_6, %c0_7, %c0_8] : memref<1x128x256xf32, #tpu.memory_space<vmem>>, vector<1x128x256xf32>
    %13 = vector.shape_cast %12 : vector<1x128x256xf32> to vector<128x256xf32>
    %14 = vector.shape_cast %11 : vector<128x256xf32> to vector<1x128x256xf32>
    tpu.vector_store %arg6[%c0_6, %c0_7, %c0_8], %14 {strides = array<i32>} : memref<1x128x256xf32, #tpu.memory_space<vmem>>, vector<1x128x256xf32>,
    return
  }
  func.func @transform_0(%arg0: i32, %arg1: i32, %arg2: i32) -> (i32, i32, i32) {
    %c0_i32 = arith.constant 0 : i32
    return %arg0, %arg1, %arg2 : i32, i32, i32
  }
  func.func @transform_1(%arg0: i32, %arg1: i32, %arg2: i32) -> (i32, i32) {
    %c0_i32 = arith.constant 0 : i32
    %c0_i32_0 = arith.constant 0 : i32
    return %c0_i32, %arg2 : i32, i32
  }
  func.func @transform_2(%arg0: i32, %arg1: i32, %arg2: i32) -> (i32, i32) {
    %c0_i32 = arith.constant 0 : i32
    %c0_i32_0 = arith.constant 0 : i32
    return %c0_i32, %arg2 : i32, i32
  }
  func.func @transform_3(%arg0: i32, %arg1: i32, %arg2: i32) -> (i32, i32, i32) {
    %c0_i32 = arith.constant 0 : i32
    return %arg0, %arg2, %arg1 : i32, i32, i32
  }
}

</mosaic_0001>

<bundles_post_ra>
// kernel: bn_conv2d.3
= control target key start
LH: loop header
LB: loop body
LE: loop exit
PB: predicated region body
PF: predicated region fallthrough
CT: control target
= control target key end

     0   :  { %s839_s12 = smov 0   ;;  %s841_s13 = smov 0   ;;  %s1002_s0 = inlined_call_operand.vmem [shape: bf16[2,256,128], index: 0, kind: input, shape index: {}]   ;;  %s1003_s1 = inlined_call_operand.vmem [shape: f32[1,128], index: 1, kind: input, shape index: {}]   ;;  %s1004_s2 = inlined_call_operand.vmem [shape: f32[1,128], index: 2, kind: input, shape index: {}]   ;;  %s1005_s3 = inlined_call_operand.vmem [shape: f32[2,128,256], index: 3, kind: output, shape index: {}]  }
   0x1   :  { %s843_s14 = smov 0  }
   0x2 LB: > { %s32_s15 = sadd.s32 1, %s813_s13  ;;  %p681_p0 = scmp.ge.s32.totalorder %s817_s14, 1  ;;  %s817_s14 = sphi %s843_s14, %s13_s14   ;;  %s813_s13 = sphi %s841_s13, %s1007_s13   ;;  %s809_s12 = sphi %s839_s12, %s1006_s12  }
   0x3   : > { %p34_p1 = scmp.ge.s32.totalorder %s32_s15, 2  ;;  %p188_p2 = scmp.lt.s32.totalorder %s817_s14, 3 }
   0x5   : > { %s1009_s15 = smov (%p34_p1, %s32_s15), 0  ;;  %p189_p3 = pnand %p681_p0, %p188_p2 }
   0x6   : > { %p235_p4 = scmp.lt.s32.totalorder (!%p189_p3), %s809_s12, 1  ;;  %v868_v0 = vld [vmem:[%s1003_s1] ss:$0 sm:$0xff] (!%p189_p3) }
   0x7   : > { %192 = sbr.rel (%p189_p3) target bundleno = 217 (0xd9), region = 32  ;;  %v877_v9 = vld [vmem:[%s1004_s2] ss:$0 sm:$0xff] (!%p189_p3) }
   0xe   : > { %s1011_s12 = smov (!%p235_p4, %s809_s12), 1 }
   0xf   : > { %s690_s16 = sshll.u32 %s1011_s12, 7  ;;  %s691_s24 = sshll.u32 %s1011_s12, 8 }
  0x10   : > { %s863_s19 = scalar_lea.vmem %s1002_s0, %s690_s16  ;;  %s959_s27 = scalar_lea.vmem %s1005_s3, %s691_s24 }
  0x11   : > { %v763_v1 = vld [vmem:[%s863_s19 + $0x40] sm:$0xff]   ;;  %v764_v3 = vld [vmem:[%s863_s19 + $0x48] sm:$0xff]   ;;  %v765_v24 = vld [vmem:[%s863_s19 + $0x50] sm:$0xff]  }
  0x12   : > { %v693_v2 = vld [vmem:[%s863_s19] sm:$0xff]   ;;  %v726_v4 = vunpack.c.l.bf16 %v763_v1  ;;  %v727_v6 = vunpack.c.h.bf16 %v763_v1  ;;  %v756_v8 = vld [vmem:[%s863_s19 + $0x8] sm:$0xff]   ;;  %v730_v10 = vunpack.c.l.bf16 %v764_v3  ;;  %v731_v18 = vunpack.c.h.bf16 %v764_v3  ;;  %v757_v25 = vld [vmem:[%s863_s19 + $0x10] sm:$0xff]  }
  0x13   : > { %v694_v5 = vunpack.c.l.bf16 %v693_v2  ;;  %v695_v7 = vunpack.c.h.bf16 %v693_v2  ;;  %v698_v11 = vunpack.c.l.bf16 %v756_v8  ;;  %v699_v19 = vunpack.c.h.bf16 %v756_v8  ;;  %v766_v44 = vld [vmem:[%s863_s19 + $0x58] sm:$0xff]   ;;  %v767_v62 = vld [vmem:[%s863_s19 + $0x60] sm:$0xff]  }
  0x14   : > { %v356_v12 = vmul.f32 %v726_v4, %v868_v0  ;;  %v357_v14 = vmul.f32 %v727_v6, %v868_v0  ;;  %v358_v16 = vmul.f32 %v730_v10, %v868_v0  ;;  %v359_v30 = vmul.f32 %v731_v18, %v868_v0  ;;  %v758_v45 = vld [vmem:[%s863_s19 + $0x18] sm:$0xff]   ;;  %v759_v63 = vld [vmem:[%s863_s19 + $0x20] sm:$0xff]   ;;  %v768_v18 = vld [vmem:[%s863_s19 + $0x68] sm:$0xff]  }
  0x15   : > { %v340_v13 = vmul.f32 %v694_v5, %v868_v0  ;;  %v341_v15 = vmul.f32 %v695_v7, %v868_v0  ;;  %v342_v17 = vmul.f32 %v698_v11, %v868_v0  ;;  %v343_v31 = vmul.f32 %v699_v19, %v868_v0  ;;  %v760_v19 = vld [vmem:[%s863_s19 + $0x28] sm:$0xff]  }
  0x16   : > { %v395_v20 = vadd.f32 %v877_v9, %v356_v12  ;;  %v396_v22 = vadd.f32 %v877_v9, %v357_v14  ;;  %v397_v28 = vadd.f32 %v877_v9, %v358_v16  ;;  %v734_v34 = vunpack.c.l.bf16 %v765_v24 }
  0x17   : > { %v379_v21 = vadd.f32 %v877_v9, %v340_v13  ;;  %v380_v23 = vadd.f32 %v877_v9, %v341_v15  ;;  %v381_v29 = vadd.f32 %v877_v9, %v342_v17  ;;  %v702_v35 = vunpack.c.l.bf16 %v757_v25 }
  0x18   : > { %v427_v26 = vmax.f32 %v395_v20, 0.0  ;;  %v428_v32 = vmax.f32 %v396_v22, 0.0  ;;  %v429_v36 = vmax.f32 %v397_v28, 0.0  ;;  %v398_v37 = vadd.f32 %v877_v9, %v359_v30 }
  0x19   : > { %v411_v27 = vmax.f32 %v379_v21, 0.0  ;;  %v412_v33 = vmax.f32 %v380_v23, 0.0  ;;  %v382_v38 = vadd.f32 %v877_v9, %v343_v31  ;;  %v735_v39 = vunpack.c.h.bf16 %v765_v24 }
  0x1a   : > { %475 = vxpose.xlu1.b32.start [1/16] %v427_v26, 128  ;;  %v413_v40 = vmax.f32 %v381_v29, 0.0  ;;  %v360_v41 = vmul.f32 %v734_v34, %v868_v0  ;;  %v344_v42 = vmul.f32 %v702_v35, %v868_v0  ;;  %v703_v43 = vunpack.c.h.bf16 %v757_v25 }
  0x1b   : > { %443 = vxpose.xlu0.b32.start [1/16] %v411_v27, 128  ;;  %v430_v46 = vmax.f32 %v398_v37, 0.0  ;;  %v361_v47 = vmul.f32 %v735_v39, %v868_v0  ;;  %v738_v48 = vunpack.c.l.bf16 %v766_v44  ;;  %v706_v49 = vunpack.c.l.bf16 %v758_v45  ;;  %v761_v37 = vld [vmem:[%s863_s19 + $0x30] sm:$0xff]  }
  0x1c   : > { %v414_v50 = vmax.f32 %v382_v38, 0.0  ;;  %v399_v51 = vadd.f32 %v877_v9, %v360_v41  ;;  %v383_v52 = vadd.f32 %v877_v9, %v344_v42  ;;  %v345_v53 = vmul.f32 %v703_v43, %v868_v0 }
  0x1d   : > { %v362_v54 = vmul.f32 %v738_v48, %v868_v0  ;;  %v346_v55 = vmul.f32 %v706_v49, %v868_v0  ;;  %v739_v56 = vunpack.c.h.bf16 %v766_v44  ;;  %v707_v57 = vunpack.c.h.bf16 %v758_v45 }
  0x1e   : > { %476 = vxpose.xlu1.b32.cont [2/16] %v428_v32, 128  ;;  %v431_v58 = vmax.f32 %v399_v51, 0.0  ;;  %v415_v59 = vmax.f32 %v383_v52, 0.0  ;;  %v400_v60 = vadd.f32 %v877_v9, %v361_v47  ;;  %v384_v61 = vadd.f32 %v877_v9, %v345_v53 }
  0x1f   : > { %444 = vxpose.xlu0.b32.cont [2/16] %v412_v33, 128  ;;  %v401_v1 = vadd.f32 %v877_v9, %v362_v54  ;;  %v363_v2 = vmul.f32 %v739_v56, %v868_v0  ;;  %v347_v3 = vmul.f32 %v707_v57, %v868_v0  ;;  %v742_v4 = vunpack.c.l.bf16 %v767_v62  ;;  %v770_v54 = vld [vmem:[%s863_s19 + $0x78] sm:$0xff]  }
  0x20   : > { %v432_v5 = vmax.f32 %v400_v60, 0.0  ;;  %v416_v6 = vmax.f32 %v384_v61, 0.0  ;;  %v385_v7 = vadd.f32 %v877_v9, %v346_v55  ;;  %v710_v8 = vunpack.c.l.bf16 %v759_v63  ;;  %v762_v55 = vld [vmem:[%s863_s19 + $0x38] sm:$0xff]  }
  0x21   : > { %v433_v10 = vmax.f32 %v401_v1, 0.0  ;;  %v402_v11 = vadd.f32 %v877_v9, %v363_v2  ;;  %v386_v12 = vadd.f32 %v877_v9, %v347_v3  ;;  %v364_v13 = vmul.f32 %v742_v4, %v868_v0 }
  0x22   : > { %477 = vxpose.xlu1.b32.cont [3/16] %v429_v36, 128  ;;  %v417_v14 = vmax.f32 %v385_v7, 0.0  ;;  %v348_v15 = vmul.f32 %v710_v8, %v868_v0  ;;  %v743_v16 = vunpack.c.h.bf16 %v767_v62  ;;  %v711_v17 = vunpack.c.h.bf16 %v759_v63  ;;  %v769_v36 = vld [vmem:[%s863_s19 + $0x70] sm:$0xff]  }
  0x23   : > { %445 = vxpose.xlu0.b32.cont [3/16] %v413_v40, 128  ;;  %v434_v20 = vmax.f32 %v402_v11, 0.0  ;;  %v403_v21 = vadd.f32 %v877_v9, %v364_v13  ;;  %v746_v22 = vunpack.c.l.bf16 %v768_v18  ;;  %v714_v23 = vunpack.c.l.bf16 %v760_v19 }
  0x24   : > { %v418_v24 = vmax.f32 %v386_v12, 0.0  ;;  %v387_v25 = vadd.f32 %v877_v9, %v348_v15  ;;  %v365_v26 = vmul.f32 %v743_v16, %v868_v0  ;;  %v349_v27 = vmul.f32 %v711_v17, %v868_v0 }
  0x25   : > { %v366_v28 = vmul.f32 %v746_v22, %v868_v0  ;;  %v350_v29 = vmul.f32 %v714_v23, %v868_v0  ;;  %v747_v30 = vunpack.c.h.bf16 %v768_v18  ;;  %v715_v31 = vunpack.c.h.bf16 %v760_v19 }
  0x26   : > { %478 = vxpose.xlu1.b32.cont [4/16] %v430_v46, 128  ;;  %v435_v32 = vmax.f32 %v403_v21, 0.0  ;;  %v419_v33 = vmax.f32 %v387_v25, 0.0  ;;  %v404_v34 = vadd.f32 %v877_v9, %v365_v26  ;;  %v388_v35 = vadd.f32 %v877_v9, %v349_v27 }
  0x27   : > { %446 = vxpose.xlu0.b32.cont [4/16] %v414_v50, 128  ;;  %v405_v38 = vadd.f32 %v877_v9, %v366_v28  ;;  %v367_v39 = vmul.f32 %v747_v30, %v868_v0  ;;  %v351_v40 = vmul.f32 %v715_v31, %v868_v0  ;;  %v750_v41 = vunpack.c.l.bf16 %v769_v36 }
  0x28   : > { %v436_v42 = vmax.f32 %v404_v34, 0.0  ;;  %v420_v43 = vmax.f32 %v388_v35, 0.0  ;;  %v389_v44 = vadd.f32 %v877_v9, %v350_v29  ;;  %v718_v45 = vunpack.c.l.bf16 %v761_v37 }
  0x29   : > { %v437_v46 = vmax.f32 %v405_v38, 0.0  ;;  %v406_v47 = vadd.f32 %v877_v9, %v367_v39  ;;  %v390_v48 = vadd.f32 %v877_v9, %v351_v40  ;;  %v368_v49 = vmul.f32 %v750_v41, %v868_v0 }
  0x2a   : > { %479 = vxpose.xlu1.b32.cont [5/16] %v431_v58, 128  ;;  %v421_v50 = vmax.f32 %v389_v44, 0.0  ;;  %v352_v51 = vmul.f32 %v718_v45, %v868_v0  ;;  %v751_v52 = vunpack.c.h.bf16 %v769_v36  ;;  %v719_v53 = vunpack.c.h.bf16 %v761_v37 }
  0x2b   : > { %447 = vxpose.xlu0.b32.cont [5/16] %v415_v59, 128  ;;  %v438_v56 = vmax.f32 %v406_v47, 0.0  ;;  %v407_v57 = vadd.f32 %v877_v9, %v368_v49  ;;  %v754_v58 = vunpack.c.l.bf16 %v770_v54  ;;  %v722_v59 = vunpack.c.l.bf16 %v762_v55 }
  0x2c   : > { %v422_v60 = vmax.f32 %v390_v48, 0.0  ;;  %v391_v61 = vadd.f32 %v877_v9, %v352_v51  ;;  %v369_v62 = vmul.f32 %v751_v52, %v868_v0  ;;  %v353_v63 = vmul.f32 %v719_v53, %v868_v0 }
  0x2d   : > { %v370_v1 = vmul.f32 %v754_v58, %v868_v0  ;;  %v354_v2 = vmul.f32 %v722_v59, %v868_v0  ;;  %v755_v3 = vunpack.c.h.bf16 %v770_v54  ;;  %v723_v4 = vunpack.c.h.bf16 %v762_v55 }
  0x2e   : > { %480 = vxpose.xlu1.b32.cont [6/16] %v432_v5, 128  ;;  %v439_v5 = vmax.f32 %v407_v57, 0.0  ;;  %v408_v7 = vadd.f32 %v877_v9, %v369_v62  ;;  %v392_v8 = vadd.f32 %v877_v9, %v353_v63 }
  0x2f   : > { %448 = vxpose.xlu0.b32.cont [6/16] %v416_v6, 128  ;;  %v423_v6 = vmax.f32 %v391_v61, 0.0  ;;  %v355_v11 = vmul.f32 %v723_v4, %v868_v0  ;;  %v393_v15 = vadd.f32 %v877_v9, %v354_v2 }
  0x30   : > { %v440_v12 = vmax.f32 %v408_v7, 0.0  ;;  %v424_v13 = vmax.f32 %v392_v8, 0.0 }
  0x31   : > { %v425_v17 = vmax.f32 %v393_v15, 0.0  ;;  %v394_v19 = vadd.f32 %v877_v9, %v355_v11 }
  0x32   : > { %481 = vxpose.xlu1.b32.cont [7/16] %v433_v10, 128  ;;  %v371_v10 = vmul.f32 %v755_v3, %v868_v0 }
  0x33   : > { %449 = vxpose.xlu0.b32.cont [7/16] %v417_v14, 128  ;;  %v409_v14 = vadd.f32 %v877_v9, %v370_v1 }
  0x34   : > { %v410_v18 = vadd.f32 %v877_v9, %v371_v10 }
  0x35   : > { %v441_v16 = vmax.f32 %v409_v14, 0.0 }
  0x36   : > { %482 = vxpose.xlu1.b32.cont [8/16] %v434_v20, 128  ;;  %v442_v0 = vmax.f32 %v410_v18, 0.0  ;;  %v426_v20 = vmax.f32 %v394_v19, 0.0 }
  0x37   : > { %450 = vxpose.xlu0.b32.cont [8/16] %v418_v24, 128 }
  0x3a   : > { %483 = vxpose.xlu1.b32.cont [9/16] %v435_v32, 128 }
  0x3b   : > { %451 = vxpose.xlu0.b32.cont [9/16] %v419_v33, 128 }
  0x3e   : > { %484 = vxpose.xlu1.b32.cont [10/16] %v436_v42, 128 }
  0x3f   : > { %452 = vxpose.xlu0.b32.cont [10/16] %v420_v43, 128 }
  0x42   : > { %485 = vxpose.xlu1.b32.cont [11/16] %v437_v46, 128 }
  0x43   : > { %453 = vxpose.xlu0.b32.cont [11/16] %v421_v50, 128 }
  0x46   : > { %486 = vxpose.xlu1.b32.cont [12/16] %v438_v56, 128 }
  0x47   : > { %454 = vxpose.xlu0.b32.cont [12/16] %v422_v60, 128 }
  0x4a   : > { %487 = vxpose.xlu1.b32.cont [13/16] %v439_v5, 128 }
  0x4b   : > { %455 = vxpose.xlu0.b32.cont [13/16] %v423_v6, 128 }
  0x4e   : > { %488 = vxpose.xlu1.b32.cont [14/16] %v440_v12, 128 }
  0x4f   : > { %456 = vxpose.xlu0.b32.cont [14/16] %v424_v13, 128 }
  0x52   : > { %489 = vxpose.xlu1.b32.cont [15/16] %v441_v16, 128 }
  0x53   : > { %457 = vxpose.xlu0.b32.cont [15/16] %v425_v17, 128 }
  0x56   : > { %490 = vxpose.xlu1.b32.end [16/16] %v442_v0, 128 }
  0x57   : > { %458 = vxpose.xlu0.b32.end [16/16] %v426_v20, 128 }
  0x9a   : > { %v491_v9 = vpop.trf.xlu1 }
  0x9b   : > { %v459_v21 = vpop.trf.xlu0  ;;  %508 = vst [vmem:[%s959_s27 + $0x8] sm:$0xff] %v491_v9 }
  0x9c   : > { %507 = vst [vmem:[%s959_s27] sm:$0xff] %v459_v21 }
  0x9e   : > { %v492_v22 = vpop.trf.xlu1 }
  0x9f   : > { %v460_v23 = vpop.trf.xlu0  ;;  %510 = vst [vmem:[%s959_s27 + $0x18] sm:$0xff] %v492_v22 }
  0xa0   : > { %509 = vst [vmem:[%s959_s27 + $0x10] sm:$0xff] %v460_v23 }
  0xa2   : > { %v493_v24 = vpop.trf.xlu1 }
  0xa3   : > { %v461_v25 = vpop.trf.xlu0  ;;  %512 = vst [vmem:[%s959_s27 + $0x28] sm:$0xff] %v493_v24 }
  0xa4   : > { %511 = vst [vmem:[%s959_s27 + $0x20] sm:$0xff] %v461_v25 }
  0xa6   : > { %v494_v26 = vpop.trf.xlu1 }
  0xa7   : > { %v462_v27 = vpop.trf.xlu0  ;;  %514 = vst [vmem:[%s959_s27 + $0x38] sm:$0xff] %v494_v26 }
  0xa8   : > { %513 = vst [vmem:[%s959_s27 + $0x30] sm:$0xff] %v462_v27 }
  0xaa   : > { %v495_v28 = vpop.trf.xlu1 }
  0xab   : > { %v463_v29 = vpop.trf.xlu0  ;;  %516 = vst [vmem:[%s959_s27 + $0x48] sm:$0xff] %v495_v28 }
  0xac   : > { %515 = vst [vmem:[%s959_s27 + $0x40] sm:$0xff] %v463_v29 }
  0xae   : > { %v496_v30 = vpop.trf.xlu1 }
  0xaf   : > { %v464_v31 = vpop.trf.xlu0  ;;  %518 = vst [vmem:[%s959_s27 + $0x58] sm:$0xff] %v496_v30 }
  0xb0   : > { %517 = vst [vmem:[%s959_s27 + $0x50] sm:$0xff] %v464_v31 }
  0xb2   : > { %v497_v32 = vpop.trf.xlu1 }
  0xb3   : > { %v465_v33 = vpop.trf.xlu0  ;;  %520 = vst [vmem:[%s959_s27 + $0x68] sm:$0xff] %v497_v32 }
  0xb4   : > { %519 = vst [vmem:[%s959_s27 + $0x60] sm:$0xff] %v465_v33 }
  0xb6   : > { %v498_v34 = vpop.trf.xlu1 }
  0xb7   : > { %v466_v35 = vpop.trf.xlu0  ;;  %522 = vst [vmem:[%s959_s27 + $0x78] sm:$0xff] %v498_v34 }
  0xb8   : > { %521 = vst [vmem:[%s959_s27 + $0x70] sm:$0xff] %v466_v35 }
  0xba   : > { %v499_v36 = vpop.trf.xlu1 }
  0xbb   : > { %v467_v37 = vpop.trf.xlu0  ;;  %524 = vst [vmem:[%s959_s27 + $0x88] sm:$0xff] %v499_v36 }
  0xbc   : > { %523 = vst [vmem:[%s959_s27 + $0x80] sm:$0xff] %v467_v37 }
  0xbe   : > { %v500_v38 = vpop.trf.xlu1 }
  0xbf   : > { %v468_v39 = vpop.trf.xlu0  ;;  %526 = vst [vmem:[%s959_s27 + $0x98] sm:$0xff] %v500_v38 }
  0xc0   : > { %525 = vst [vmem:[%s959_s27 + $0x90] sm:$0xff] %v468_v39 }
  0xc2   : > { %v501_v40 = vpop.trf.xlu1 }
  0xc3   : > { %v469_v41 = vpop.trf.xlu0  ;;  %528 = vst [vmem:[%s959_s27 + $0xa8] sm:$0xff] %v501_v40 }
  0xc4   : > { %527 = vst [vmem:[%s959_s27 + $0xa0] sm:$0xff] %v469_v41 }
  0xc6   : > { %v502_v42 = vpop.trf.xlu1 }
  0xc7   : > { %v470_v43 = vpop.trf.xlu0  ;;  %530 = vst [vmem:[%s959_s27 + $0xb8] sm:$0xff] %v502_v42 }
  0xc8   : > { %529 = vst [vmem:[%s959_s27 + $0xb0] sm:$0xff] %v470_v43 }
  0xca   : > { %v503_v44 = vpop.trf.xlu1 }
  0xcb   : > { %v471_v45 = vpop.trf.xlu0  ;;  %532 = vst [vmem:[%s959_s27 + $0xc8] sm:$0xff] %v503_v44 }
  0xcc   : > { %531 = vst [vmem:[%s959_s27 + $0xc0] sm:$0xff] %v471_v45 }
  0xce   : > { %v504_v46 = vpop.trf.xlu1 }
  0xcf   : > { %v472_v47 = vpop.trf.xlu0  ;;  %534 = vst [vmem:[%s959_s27 + $0xd8] sm:$0xff] %v504_v46 }
  0xd0   : > { %533 = vst [vmem:[%s959_s27 + $0xd0] sm:$0xff] %v472_v47 }
  0xd2   : > { %v505_v48 = vpop.trf.xlu1 }
  0xd3   : > { %v473_v49 = vpop.trf.xlu0  ;;  %536 = vst [vmem:[%s959_s27 + $0xe8] sm:$0xff] %v505_v48 }
  0xd4   : > { %535 = vst [vmem:[%s959_s27 + $0xe0] sm:$0xff] %v473_v49 }
  0xd6   : > { %v506_v50 = vpop.trf.xlu1 }
  0xd7   : > { %v474_v51 = vpop.trf.xlu0  ;;  %538 = vst [vmem:[%s959_s27 + $0xf8] sm:$0xff] %v506_v50 }
  0xd8   : > { %537 = vst [vmem:[%s959_s27 + $0xf0] sm:$0xff] %v474_v51 }
  0xd9 PF: > { %s13_s14 = sadd.s32 1, %s817_s14   ;;  %s1006_s12 = smov %s813_s13 }
  0xda   : > { %p10_p5 = scmp.ge.s32.totalorder %s13_s14, 4   ;;  %s1007_s13 = smov %s1009_s15 }
  0xdc   :  { %12 = sbr.rel (!%p10_p5) target bundleno = 2 (0x2), region = 68 }

// kernel: bn_conv2d.2
= control target key start
LH: loop header
LB: loop body
LE: loop exit
PB: predicated region body
PF: predicated region fallthrough
CT: control target
= control target key end

     0   :  { %s1569_s12 = smov 0   ;;  %s1571_s13 = smov 0   ;;  %s1761_s0 = inlined_call_operand.vmem [shape: bf16[512,128], index: 0, kind: input, shape index: {}]   ;;  %s1762_s1 = inlined_call_operand.vmem [shape: bf16[128,128], index: 1, kind: input, shape index: {}]   ;;  %s1763_s2 = inlined_call_operand.vmem [shape: bf16[512,128], index: 2, kind: output, shape index: {0}]   ;;  %s1764_s3 = inlined_call_operand.vmem [shape: f32[16,128], index: 3, kind: output, shape index: {1}]  }
   0x1   :  { %s1573_s14 = smov 0  }
   0x2 LB: > { %s33_s15 = sadd.s32 1, %s1543_s13  ;;  %p1198_p0 = scmp.ge.s32.totalorder %s1547_s14, 1  ;;  %s1547_s14 = sphi %s1573_s14, %s14_s14   ;;  %s1543_s13 = sphi %s1571_s13, %s1766_s13   ;;  %s1539_s12 = sphi %s1569_s12, %s1765_s12  }
   0x3   : > { %p35_p1 = scmp.ge.s32.totalorder %s33_s15, 2  ;;  %p185_p2 = scmp.lt.s32.totalorder %s1547_s14, 3 }
   0x5   : > { %s1768_s15 = smov (%p35_p1, %s33_s15), 0  ;;  %p186_p3 = pnand %p1198_p0, %p185_p2 }
   0x6   : > { %v1501_v0 = vld [vmem:[%s1762_s1] sm:$0xff] (!%p186_p3)   ;;  %s1199_s18 = sshll.u32 (!%p186_p3), %s1539_s12, 5  ;;  %v1502_v1 = vld [vmem:[%s1762_s1 + $0x8] sm:$0xff] (!%p186_p3)   ;;  %v1503_v2 = vld [vmem:[%s1762_s1 + $0x10] sm:$0xff] (!%p186_p3)   ;;  %p257_p5 = scmp.lt.s32.totalorder (!%p186_p3), %s1539_s12, 1 }
   0x7   : > { %189 = sbr.rel (%p186_p3) target bundleno = 331 (0x14b), region = 28  ;;  %p231_p4 = scmp.lt.s32.totalorder (!%p186_p3), %s1199_s18, 63  ;;  %1413 = vmatprep.subr.bf16.mxu0 (!%p186_p3), %v1501_v0  ;;  %1461 = vmatprep.subr.bf16.mxu1 (!%p186_p3), %v1501_v0  ;;  %v1504_v3 = vld [vmem:[%s1762_s1 + $0x18] sm:$0xff] (!%p186_p3)   ;;  %v1505_v5 = vld [vmem:[%s1762_s1 + $0x20] sm:$0xff] (!%p186_p3)   ;;  %v1506_v6 = vld [vmem:[%s1762_s1 + $0x28] sm:$0xff] (!%p186_p3)  }
   0x8   : > { %1414 = vmatpush3.bf16.msra.mxu0 (!%p186_p3), %v1501_v0  ;;  %1469 = vmatpush3.bf16.msra.mxu1 (!%p186_p3), %v1501_v0  ;;  %v1507_v8 = vld [vmem:[%s1762_s1 + $0x30] sm:$0xff] (!%p186_p3)   ;;  %v1508_v9 = vld [vmem:[%s1762_s1 + $0x38] sm:$0xff] (!%p186_p3)  }
   0x9   : > { %1415 = vmatprep.subr.bf16.mxu0 (!%p186_p3), %v1502_v1  ;;  %1462 = vmatprep.subr.bf16.mxu1 (!%p186_p3), %v1502_v1 }
   0xc   : > { %1416 = vmatpush3.bf16.msra.mxu0 (!%p186_p3), %v1502_v1  ;;  %1470 = vmatpush3.bf16.msra.mxu1 (!%p186_p3), %v1502_v1 }
   0xd   : > { %1417 = vmatprep.subr.bf16.mxu0 (!%p186_p3), %v1503_v2  ;;  %1463 = vmatprep.subr.bf16.mxu1 (!%p186_p3), %v1503_v2 }
   0xe   : > { %s1770_s18 = smov (!%p231_p4, %s1199_s18), 63  ;;  %s1772_s12 = smov (!%p257_p5, %s1539_s12), 1 }
   0xf   : > { %s1200_s23 = sshll.u32 %s1770_s18, 2  ;;  %s1203_s17 = sshll.u32 %s1772_s12, 3 }
  0x10   : > { %s1607_s26 = scalar_lea.vmem %s1761_s0, %s1200_s23  ;;  %1418 = vmatpush3.bf16.msra.mxu0 %v1503_v2  ;;  %1471 = vmatpush3.bf16.msra.mxu1 %v1503_v2  ;;  %s1649_s16 = scalar_lea.vmem %s1763_s2, %s1200_s23 }
  0x11   : > { %v1509_v4 = vld [vmem:[%s1607_s26] sm:$0xff]   ;;  %1419 = vmatprep.subr.bf16.mxu0 %v1504_v3  ;;  %1464 = vmatprep.subr.bf16.mxu1 %v1504_v3  ;;  %v1510_v10 = vld [vmem:[%s1607_s26 + $0x8] sm:$0xff]   ;;  %v1511_v12 = vld [vmem:[%s1607_s26 + $0x10] sm:$0xff]   ;;  %s263_s20 = scalar_lea.vmem %s1764_s3, %s1203_s17 }
  0x12   : > { %1429 = vmatprep.mubr.bf16.mxu0 %v1509_v4  ;;  %v1517_v7 = vld [vmem:[%s1607_s26 + $0x40] sm:$0xff]   ;;  %v1518_v11 = vld [vmem:[%s1607_s26 + $0x48] sm:$0xff]   ;;  %v1519_v13 = vld [vmem:[%s1607_s26 + $0x50] sm:$0xff]  }
  0x13   : > { %1445 = vmatprep.mubr.bf16.mxu1 %v1517_v7  ;;  %v1512_v14 = vld [vmem:[%s1607_s26 + $0x18] sm:$0xff]   ;;  %v1513_v16 = vld [vmem:[%s1607_s26 + $0x20] sm:$0xff]   ;;  %v1514_v18 = vld [vmem:[%s1607_s26 + $0x28] sm:$0xff]  }
  0x14   : > { %1420 = vmatpush3.bf16.msra.mxu0 %v1504_v3  ;;  %1472 = vmatpush3.bf16.msra.mxu1 %v1504_v3  ;;  %v1520_v15 = vld [vmem:[%s1607_s26 + $0x58] sm:$0xff]   ;;  %v1521_v17 = vld [vmem:[%s1607_s26 + $0x60] sm:$0xff]   ;;  %v1522_v19 = vld [vmem:[%s1607_s26 + $0x68] sm:$0xff]  }
  0x15   : > { %1421 = vmatprep.subr.bf16.mxu0 %v1505_v5  ;;  %1465 = vmatprep.subr.bf16.mxu1 %v1505_v5  ;;  %v1515_v20 = vld [vmem:[%s1607_s26 + $0x30] sm:$0xff]   ;;  %v1516_v22 = vld [vmem:[%s1607_s26 + $0x38] sm:$0xff]  }
  0x16   : > { %v1523_v21 = vld [vmem:[%s1607_s26 + $0x70] sm:$0xff]   ;;  %v1524_v23 = vld [vmem:[%s1607_s26 + $0x78] sm:$0xff]  }
  0x18   : > { %1422 = vmatpush3.bf16.msra.mxu0 %v1505_v5  ;;  %1473 = vmatpush3.bf16.msra.mxu1 %v1505_v5 }
  0x19   : > { %1423 = vmatprep.subr.bf16.mxu0 %v1506_v6  ;;  %1466 = vmatprep.subr.bf16.mxu1 %v1506_v6 }
  0x1c   : > { %1424 = vmatpush3.bf16.msra.mxu0 %v1506_v6  ;;  %1474 = vmatpush3.bf16.msra.mxu1 %v1506_v6 }
  0x1d   : > { %1425 = vmatprep.subr.bf16.mxu0 %v1507_v8  ;;  %1467 = vmatprep.subr.bf16.mxu1 %v1507_v8 }
  0x20   : > { %1426 = vmatpush3.bf16.msra.mxu0 %v1507_v8  ;;  %1475 = vmatpush3.bf16.msra.mxu1 %v1507_v8 }
  0x21   : > { %1427 = vmatprep.subr.bf16.mxu0 %v1508_v9  ;;  %1468 = vmatprep.subr.bf16.mxu1 %v1508_v9 }
  0x24   : > { %1428 = vmatpush3.bf16.msra.mxu0 %v1508_v9  ;;  %1476 = vmatpush3.bf16.msra.mxu1 %v1508_v9 }
  0x27   : > { %1430 = vmatmul.mubr.bf16.vlgmr.msra.gmra.mrb[0].mxu0 %v1510_v10  ;;  %1446 = vmatmul.mubr.bf16.vlgmr.msra.gmra.mrb[0].mxu1 %v1518_v11 }
  0x28   : > { %1433 = vmatprep.mubr.bf16.mxu0 %v1511_v12  ;;  %1449 = vmatprep.mubr.bf16.mxu1 %v1519_v13 }
  0x2f   : > { %1434 = vmatmul.mubr.bf16.gmra.mrb[4].mxu0 %v1512_v14  ;;  %1450 = vmatmul.mubr.bf16.gmra.mrb[4].mxu1 %v1520_v15 }
  0x30   : > { %1437 = vmatprep.mubr.bf16.mxu0 %v1513_v16  ;;  %1453 = vmatprep.mubr.bf16.mxu1 %v1521_v17 }
  0x37   : > { %1438 = vmatmul.mubr.bf16.gmra.mrb[8].mxu0 %v1514_v18  ;;  %1454 = vmatmul.mubr.bf16.gmra.mrb[8].mxu1 %v1522_v19 }
  0x38   : > { %1441 = vmatprep.mubr.bf16.mxu0 %v1515_v20  ;;  %1457 = vmatprep.mubr.bf16.mxu1 %v1523_v21 }
  0x3f   : > { %1442 = vmatmul.mubr.bf16.gmra.mrb[12].mxu0 %v1516_v22  ;;  %1458 = vmatmul.mubr.bf16.gmra.mrb[12].mxu1 %v1524_v23 }
  0xfa   : > { %v1431_v24 = vpop.f32.mrb[0].mxu0  ;;  %v1640_v25 = vpop.f32.mrb[0].mxu1 }
  0xfb   : > { %v559_v26 = vpop.f32.mrb[1].mxu0  ;;  %v1642_v27 = vpop.f32.mrb[1].mxu1  ;;  %v985_v39 = vmul.f32 %v1431_v24, %v1431_v24 }
  0xfc   : > { %v1432_v28 = vpop.f32.mrb[2].mxu0  ;;  %v1651_v29 = vpop.f32.mrb[2].mxu1  ;;  %v983_v30 = vmul.f32 %v559_v26, %v559_v26 }
  0xfd   : > { %v1302_v31 = vpack.c.bf16 %v1432_v28, %v1431_v24  ;;  %v562_v32 = vpop.f32.mrb[3].mxu0  ;;  %v1342_v33 = vpack.c.bf16 %v1651_v29, %v1640_v25  ;;  %v1655_v34 = vpop.f32.mrb[3].mxu1  ;;  %v986_v42 = vmul.f32 %v1432_v28, %v1432_v28 }
  0xfe   : > { %v1297_v35 = vpack.c.bf16 %v562_v32, %v559_v26  ;;  %v945_v36 = vadd.f32 %v562_v32, %v559_v26  ;;  %v984_v37 = vmul.f32 %v562_v32, %v562_v32  ;;  %v1337_v38 = vpack.c.bf16 %v1655_v34, %v1642_v27 }
  0xff   : > { %1374 = vst [vmem:[%s1649_s16 + $0x8] sm:$0xff] %v1302_v31   ;;  %1382 = vst [vmem:[%s1649_s16 + $0x48] sm:$0xff] %v1342_v33  }
 0x100   : > { %1298 = vst [vmem:[%s1649_s16] sm:$0xff] %v1297_v35   ;;  %v946_v40 = vadd.f32 %v1431_v24, %v945_v36  ;;  %v1015_v41 = vadd.f32 %v984_v37, %v983_v30  ;;  %1381 = vst [vmem:[%s1649_s16 + $0x40] sm:$0xff] %v1337_v38  }
 0x102   : > { %v1016_v43 = vadd.f32 %v1015_v41, %v985_v39  ;;  %v1435_v44 = vpop.f32.mrb[4].mxu0  ;;  %v947_v45 = vadd.f32 %v1432_v28, %v946_v40  ;;  %v1663_v46 = vpop.f32.mrb[4].mxu1 }
 0x103   : > { %v575_v47 = vpop.f32.mrb[5].mxu0  ;;  %v1665_v48 = vpop.f32.mrb[5].mxu1  ;;  %v989_v63 = vmul.f32 %v1435_v44, %v1435_v44 }
 0x104   : > { %v948_v49 = vadd.f32 %v947_v45, %v575_v47  ;;  %v987_v50 = vmul.f32 %v575_v47, %v575_v47  ;;  %v1017_v51 = vadd.f32 %v1016_v43, %v986_v42  ;;  %v1436_v52 = vpop.f32.mrb[6].mxu0  ;;  %v1667_v53 = vpop.f32.mrb[6].mxu1 }
 0x105   : > { %v1312_v54 = vpack.c.bf16 %v1436_v52, %v1435_v44  ;;  %v578_v55 = vpop.f32.mrb[7].mxu0  ;;  %v1352_v56 = vpack.c.bf16 %v1667_v53, %v1663_v46  ;;  %v1671_v57 = vpop.f32.mrb[7].mxu1  ;;  %v990_v2 = vmul.f32 %v1436_v52, %v1436_v52 }
 0x106   : > { %v1018_v58 = vadd.f32 %v1017_v51, %v987_v50  ;;  %v1307_v59 = vpack.c.bf16 %v578_v55, %v575_v47  ;;  %v949_v60 = vadd.f32 %v948_v49, %v578_v55  ;;  %v988_v61 = vmul.f32 %v578_v55, %v578_v55 }
 0x107   : > { %1376 = vst [vmem:[%s1649_s16 + $0x18] sm:$0xff] %v1312_v54   ;;  %1384 = vst [vmem:[%s1649_s16 + $0x58] sm:$0xff] %v1352_v56   ;;  %v1347_v62 = vpack.c.bf16 %v1671_v57, %v1665_v48 }
 0x108   : > { %1375 = vst [vmem:[%s1649_s16 + $0x10] sm:$0xff] %v1307_v59   ;;  %v950_v0 = vadd.f32 %v1435_v44, %v949_v60  ;;  %v1019_v1 = vadd.f32 %v1018_v58, %v988_v61  ;;  %v999_v61 = vmul.f32 %v1642_v27, %v1642_v27 }
 0x109   : > { %1383 = vst [vmem:[%s1649_s16 + $0x50] sm:$0xff] %v1347_v62  }
 0x10a   : > { %v1020_v3 = vadd.f32 %v1019_v1, %v989_v63  ;;  %v1439_v4 = vpop.f32.mrb[8].mxu0  ;;  %v951_v5 = vadd.f32 %v1436_v52, %v950_v0  ;;  %v1679_v6 = vpop.f32.mrb[8].mxu1 }
 0x10b   : > { %v591_v7 = vpop.f32.mrb[9].mxu0  ;;  %v1681_v8 = vpop.f32.mrb[9].mxu1  ;;  %v993_v23 = vmul.f32 %v1439_v4, %v1439_v4 }
 0x10c   : > { %v952_v9 = vadd.f32 %v951_v5, %v591_v7  ;;  %v991_v10 = vmul.f32 %v591_v7, %v591_v7  ;;  %v1021_v11 = vadd.f32 %v1020_v3, %v990_v2  ;;  %v1440_v12 = vpop.f32.mrb[10].mxu0  ;;  %v1683_v13 = vpop.f32.mrb[10].mxu1  ;;  %v1000_v2 = vmul.f32 %v1655_v34, %v1655_v34 }
 0x10d   : > { %v1322_v14 = vpack.c.bf16 %v1440_v12, %v1439_v4  ;;  %v594_v15 = vpop.f32.mrb[11].mxu0  ;;  %v1362_v16 = vpack.c.bf16 %v1683_v13, %v1679_v6  ;;  %v1687_v17 = vpop.f32.mrb[11].mxu1  ;;  %v994_v28 = vmul.f32 %v1440_v12, %v1440_v12  ;;  %v1001_v3 = vmul.f32 %v1640_v25, %v1640_v25 }
 0x10e   : > { %v1022_v18 = vadd.f32 %v1021_v11, %v991_v10  ;;  %v1317_v19 = vpack.c.bf16 %v594_v15, %v591_v7  ;;  %v953_v20 = vadd.f32 %v952_v9, %v594_v15  ;;  %v992_v21 = vmul.f32 %v594_v15, %v594_v15 }
 0x10f   : > { %1378 = vst [vmem:[%s1649_s16 + $0x28] sm:$0xff] %v1322_v14   ;;  %1386 = vst [vmem:[%s1649_s16 + $0x68] sm:$0xff] %v1362_v16   ;;  %v1357_v22 = vpack.c.bf16 %v1687_v17, %v1681_v8  ;;  %v1002_v7 = vmul.f32 %v1651_v29, %v1651_v29  ;;  %v1004_v15 = vmul.f32 %v1671_v57, %v1671_v57 }
 0x110   : > { %1377 = vst [vmem:[%s1649_s16 + $0x20] sm:$0xff] %v1317_v19   ;;  %v954_v24 = vadd.f32 %v1439_v4, %v953_v20  ;;  %v1023_v26 = vadd.f32 %v1022_v18, %v992_v21 }
 0x111   : > { %1385 = vst [vmem:[%s1649_s16 + $0x60] sm:$0xff] %v1357_v22  }
 0x112   : > { %v1024_v30 = vadd.f32 %v1023_v26, %v993_v23  ;;  %v1443_v31 = vpop.f32.mrb[12].mxu0  ;;  %v955_v32 = vadd.f32 %v1440_v12, %v954_v24  ;;  %v1695_v33 = vpop.f32.mrb[12].mxu1  ;;  %v1008_v24 = vmul.f32 %v1687_v17, %v1687_v17 }
 0x113   : > { %v607_v35 = vpop.f32.mrb[13].mxu0  ;;  %v671_v36 = vpop.f32.mrb[13].mxu1  ;;  %v997_v54 = vmul.f32 %v1443_v31, %v1443_v31 }
 0x114   : > { %v956_v37 = vadd.f32 %v955_v32, %v607_v35  ;;  %v995_v38 = vmul.f32 %v607_v35, %v607_v35  ;;  %v1025_v39 = vadd.f32 %v1024_v30, %v994_v28  ;;  %v1444_v40 = vpop.f32.mrb[14].mxu0  ;;  %v1697_v41 = vpop.f32.mrb[14].mxu1 }
 0x115   : > { %v1332_v42 = vpack.c.bf16 %v1444_v40, %v1443_v31  ;;  %v610_v43 = vpop.f32.mrb[15].mxu0  ;;  %v1372_v44 = vpack.c.bf16 %v1697_v41, %v1695_v33  ;;  %v674_v45 = vpop.f32.mrb[15].mxu1  ;;  %v998_v58 = vmul.f32 %v1444_v40, %v1444_v40 }
 0x116   : > { %v1026_v47 = vadd.f32 %v1025_v39, %v995_v38  ;;  %v1327_v49 = vpack.c.bf16 %v610_v43, %v607_v35  ;;  %v957_v50 = vadd.f32 %v956_v37, %v610_v43  ;;  %v996_v51 = vmul.f32 %v610_v43, %v610_v43 }
 0x117   : > { %1380 = vst [vmem:[%s1649_s16 + $0x38] sm:$0xff] %v1332_v42   ;;  %1388 = vst [vmem:[%s1649_s16 + $0x78] sm:$0xff] %v1372_v44   ;;  %v1367_v52 = vpack.c.bf16 %v674_v45, %v671_v36  ;;  %v1013_v39 = vmul.f32 %v1695_v33, %v1695_v33  ;;  %v1014_v42 = vmul.f32 %v1697_v41, %v1697_v41 }
 0x118   : > { %1379 = vst [vmem:[%s1649_s16 + $0x30] sm:$0xff] %v1327_v49   ;;  %v958_v55 = vadd.f32 %v1443_v31, %v957_v50  ;;  %v1027_v56 = vadd.f32 %v1026_v47, %v996_v51  ;;  %v1011_v31 = vmul.f32 %v671_v36, %v671_v36 }
 0x119   : > { %1387 = vst [vmem:[%s1649_s16 + $0x70] sm:$0xff] %v1367_v52  }
 0x11a   : > { %v1028_v59 = vadd.f32 %v1027_v56, %v997_v54  ;;  %v959_v60 = vadd.f32 %v1444_v40, %v958_v55 }
 0x11c   : > { %v960_v62 = vadd.f32 %v959_v60, %v1642_v27  ;;  %v1029_v63 = vadd.f32 %v1028_v59, %v998_v58  ;;  %v1003_v27 = vmul.f32 %v1665_v48, %v1665_v48 }
 0x11e   : > { %v1030_v0 = vadd.f32 %v1029_v63, %v999_v61  ;;  %v961_v1 = vadd.f32 %v960_v62, %v1655_v34 }
 0x120   : > { %v962_v4 = vadd.f32 %v1640_v25, %v961_v1  ;;  %v1031_v5 = vadd.f32 %v1030_v0, %v1000_v2  ;;  %v1005_v25 = vmul.f32 %v1663_v46, %v1663_v46 }
 0x122   : > { %v1032_v9 = vadd.f32 %v1031_v5, %v1001_v3  ;;  %v963_v10 = vadd.f32 %v1651_v29, %v962_v4  ;;  %v1006_v29 = vmul.f32 %v1667_v53, %v1667_v53 }
 0x124   : > { %v964_v11 = vadd.f32 %v963_v10, %v1665_v48  ;;  %v1033_v12 = vadd.f32 %v1032_v9, %v1002_v7  ;;  %v1007_v48 = vmul.f32 %v1681_v8, %v1681_v8 }
 0x126   : > { %v1034_v14 = vadd.f32 %v1033_v12, %v1003_v27  ;;  %v965_v34 = vadd.f32 %v964_v11, %v1671_v57 }
 0x128   : > { %v966_v16 = vadd.f32 %v1663_v46, %v965_v34  ;;  %v1035_v18 = vadd.f32 %v1034_v14, %v1004_v15  ;;  %v1009_v46 = vmul.f32 %v1679_v6, %v1679_v6 }
 0x12a   : > { %v1036_v19 = vadd.f32 %v1035_v18, %v1005_v25  ;;  %v967_v20 = vadd.f32 %v1667_v53, %v966_v16  ;;  %v1010_v53 = vmul.f32 %v1683_v13, %v1683_v13 }
 0x12c   : > { %v968_v21 = vadd.f32 %v967_v20, %v1681_v8  ;;  %v1037_v22 = vadd.f32 %v1036_v19, %v1006_v29 }
 0x12e   : > { %v1038_v23 = vadd.f32 %v1037_v22, %v1007_v48  ;;  %v969_v57 = vadd.f32 %v968_v21, %v1687_v17  ;;  %v1012_v17 = vmul.f32 %v674_v45, %v674_v45 }
 0x130   : > { %v970_v26 = vadd.f32 %v1679_v6, %v969_v57  ;;  %v1039_v28 = vadd.f32 %v1038_v23, %v1008_v24 }
 0x132   : > { %v1040_v30 = vadd.f32 %v1039_v28, %v1009_v46  ;;  %v971_v8 = vadd.f32 %v1683_v13, %v970_v26 }
 0x134   : > { %v972_v32 = vadd.f32 %v971_v8, %v671_v36  ;;  %v1041_v35 = vadd.f32 %v1040_v30, %v1010_v53 }
 0x136   : > { %v1042_v37 = vadd.f32 %v1041_v35, %v1011_v31  ;;  %v973_v38 = vadd.f32 %v972_v32, %v674_v45 }
 0x138   : > { %v974_v40 = vadd.f32 %v1695_v33, %v973_v38  ;;  %v1043_v6 = vadd.f32 %v1042_v37, %v1012_v17 }
 0x13a   : > { %v975_v43 = vadd.f32 %v1697_v41, %v974_v40  ;;  %v1044_v13 = vadd.f32 %v1043_v6, %v1013_v39 }
 0x13c   : > { %v976_v44 = vrot.slane %v975_v43, 4  ;;  %v1045_v47 = vadd.f32 %v1044_v13, %v1014_v42 }
 0x13e   : > { %v977_v36 = vadd.f32 %v976_v44, %v975_v43  ;;  %v1046_v49 = vrot.slane %v1045_v47, 4 }
 0x140   : > { %v978_v50 = vrot.slane %v977_v36, 2  ;;  %v1047_v45 = vadd.f32 %v1046_v49, %v1045_v47 }
 0x142   : > { %v979_v51 = vadd.f32 %v978_v50, %v977_v36  ;;  %v1048_v52 = vrot.slane %v1047_v45, 2 }
 0x144   : > { %v980_v54 = vrot.slane %v979_v51, 1  ;;  %v1049_v33 = vadd.f32 %v1048_v52, %v1047_v45 }
 0x146   : > { %v981_v55 = vadd.f32 %v980_v54, %v979_v51  ;;  %v1050_v56 = vrot.slane %v1049_v33, 1 }
 0x148   : > { %982 = vst [vmem:[%s263_s20] sm:$0x1] %v981_v55  ;;  %v1051_v41 = vadd.f32 %v1050_v56, %v1049_v33 }
 0x14a   : > { %1052 = vst [vmem:[%s263_s20 + $0x1] sm:$0x1] %v1051_v41 }
 0x14b PF: > { %s14_s14 = sadd.s32 1, %s1547_s14   ;;  %s1765_s12 = smov %s1543_s13 }
 0x14c   : > { %p11_p6 = scmp.ge.s32.totalorder %s14_s14, 4   ;;  %s1766_s13 = smov %s1768_s15 }
 0x14e   :  { %13 = sbr.rel (!%p11_p6) target bundleno = 2 (0x2), region = 81 }

</bundles_post_ra>
